<compile_context>
chip_gen: v6e
topology: v6e:2x2x1
jax: 0.10.0
libtpu: 0.0.40
codegen_flags: <defaults>
</compile_context>

<pallas_src>
import functools

import jax
import jax.numpy as jnp
from jax.experimental import pallas as pl
from jax.experimental.pallas import tpu as pltpu

_LANES = 128
_LEFT_PAD = 128          # lane-aligned left pad inside the staging scratch (>= K-1)


def _round_up(x, m):
    return (x + m - 1) // m * m


def _convtr1d_kernel(x_ref, w_ref, b_ref, o_ref, xpad_ref,
                     *, K, C_in, L_in, L_out, S, P, Bt):
    """One grid step computes `Bt` batch elements, batch fused onto the lane axis.

    x_ref   : [Bt, C_in, L_in ]   VMEM (NCL input block)
    w_ref   : [K,  C_out, C_in]   VMEM (w_ref[k] == weight[:, :, k].T)
    b_ref   : [C_out, 1]          VMEM
    o_ref   : [C_out, Bt*S]       VMEM (lane-dense; batch b lives in lanes [b*S, b*S+L_out))
    xpad_ref: [C_in, P + Bt*S]    VMEM scratch (batch b's x at lanes [b*S+P, b*S+P+L_in))
    """
    halo = K - 1

    # --- stage the input: lane-aligned per-batch copies + halo-only zeroing --------
    if halo > 0:
        zeros_halo = jnp.zeros((C_in, halo), xpad_ref.dtype)
    for b in range(Bt):
        base = b * S + P                         # static, multiple of 128 -> aligned store
        if halo > 0:
            xpad_ref[:, pl.ds(base - halo, halo)] = zeros_halo   # left halo
            xpad_ref[:, pl.ds(base + L_in, halo)] = zeros_halo   # right halo
        xpad_ref[:, pl.ds(base, L_in)] = x_ref[b]
    # Lanes outside [base-halo, base+L_out) are never read for real output positions;
    # whatever they contain only feeds the padding lanes the wrapper slices away.

    # --- vreg-resident accumulator, bias-initialised -------------------------------
    acc = jnp.broadcast_to(b_ref[...].astype(jnp.float32), o_ref.shape)

    # Transposed conv (stride=1, pad=0): out[b,co,t] = bias + sum_k W_k @ x[b,:,t-k].
    # Flat layout: out_flat[:, j] = bias + sum_k W_k @ xpad_flat[:, j + P - k].
    # One [C_out, C_in] @ [C_in, Bt*S] MXU contraction per tap (batch fused into N).
    # TODO(synk): on v5e an im2col K-fusion ([C_out, K*C_in] single matmul) would cut
    #             the sequential MRF pops K-fold; per-tap form kept (cheap on v6e/v7x).
    for k in range(K):
        xs = xpad_ref[:, pl.ds(P - k, Bt * S)]   # contiguous shifted read, static offset
        acc = acc + jnp.dot(w_ref[k], xs, preferred_element_type=jnp.float32)

    o_ref[...] = acc.astype(o_ref.dtype)         # single lane-dense output store


def _vmem_capacity_bytes():
    try:
        cap = int(pltpu.get_tpu_info().vmem_capacity_bytes)
        if cap > 0:
            return cap
    except Exception:
        pass
    return 64 << 20          # conservative fallback (v7x per-TensorCore VMEM)


def _pick_block_batch(B, C_in, C_out, L_in, S, P, itemsize, vmem_cap):
    """Largest divisor of B that fits the VMEM + vreg-accumulator budgets while keeping
    >= min(4, B) grid steps (>= 2 pipelined steps per TensorCore on dual-TC chips)."""
    def step_bytes(bt):
        x_in = 2 * bt * C_in * L_in * itemsize        # double-buffered input block
        out = 2 * C_out * bt * S * itemsize           # double-buffered output block
        xpad = C_in * (P + bt * S) * itemsize         # staging scratch
        return x_in + out + xpad

    vmem_budget = vmem_cap // 4                       # headroom for compiler internals
    vreg_budget = 32 * 4096                           # ~half of the 64 x 4KiB vreg file
    bt_acc_cap = max(1, vreg_budget // max(1, C_out * S * 4))
    min_steps = min(4, B)

    best = 1
    for bt in range(1, B + 1):
        if B % bt != 0 or bt > bt_acc_cap:
            continue
        if step_bytes(bt) > vmem_budget or (B // bt) < min_steps:
            continue
        best = bt
    return best, step_bytes(best)


def norm_conv_transpose1d(x_ncl, weight, bias, *, block_batch=None):
    """x_ncl: [B, C_in, L_in]; weight: [C_in, C_out, K]; bias: [C_out].

    Returns y: [B, C_out, L_out], matching nn.ConvTranspose1d defaults + Identity norm.
    """
    B, C_in, L_in = x_ncl.shape
    w_cin, C_out, K = weight.shape
    assert w_cin == C_in, (w_cin, C_in)
    assert K - 1 <= _LEFT_PAD, "kernel size exceeds the lane-aligned left pad"
    L_out = L_in + K - 1                      # stride=1, padding=0, output_padding=0
    S = _round_up(L_out, _LANES)              # lane-dense per-batch output segment
    P = _LEFT_PAD
    itemsize = jnp.dtype(x_ncl.dtype).itemsize

    vmem_cap = _vmem_capacity_bytes()
    if block_batch is not None:
        bt, step_bytes = block_batch, None
    else:
        bt, step_bytes = _pick_block_batch(B, C_in, C_out, L_in, S, P, itemsize, vmem_cap)
    assert B % bt == 0, (B, bt)
    grid = (B // bt,)

    # Only raise the scoped-VMEM limit when the working set actually needs it.
    vmem_limit = None
    if step_bytes is not None and step_bytes > (24 << 20):
        vmem_limit = min(vmem_cap * 3 // 4, max(32 << 20, 2 * step_bytes))

    # Tiny parameter-only relayout (C_in*C_out*K elements) -- negligible vs. x / out.
    w_t = jnp.transpose(weight, (2, 1, 0))    # [K, C_out, C_in]
    b2 = bias.reshape(C_out, 1)               # broadcasts across the lane (L) axis

    kernel = functools.partial(_convtr1d_kernel, K=K, C_in=C_in, L_in=L_in,
                               L_out=L_out, S=S, P=P, Bt=bt)

    out_flat = pl.pallas_call(
        kernel,
        out_shape=jax.ShapeDtypeStruct((C_out, B * S), x_ncl.dtype),
        grid_spec=pltpu.PrefetchScalarGridSpec(
            num_scalar_prefetch=0,
            grid=grid,
            in_specs=[
                pl.BlockSpec((bt, C_in, L_in), lambda i: (i, 0, 0)),
                pl.BlockSpec((K, C_out, C_in), lambda i: (0, 0, 0)),
                pl.BlockSpec((C_out, 1), lambda i: (0, 0)),
            ],
            out_specs=pl.BlockSpec((C_out, bt * S), lambda i: (0, i)),
            scratch_shapes=[
                pltpu.VMEM((C_in, P + bt * S), x_ncl.dtype),
            ],
        ),
        compiler_params=pltpu.CompilerParams(
            dimension_semantics=("parallel",),
            vmem_limit_bytes=vmem_limit,
        ),
    )(x_ncl, w_t, b2)

    # Cheap wrapper-side relayout of the tiny (padded) result:
    # [C_out, B*S] -> [C_out, B, S] -> drop lane padding -> [B, C_out, L_out].
    out = out_flat.reshape(C_out, B, S)[:, :, :L_out]
    return jnp.transpose(out, (1, 0, 2))


def _reference_conv_transpose1d(x_ncl, weight, bias):
    """Pure-JAX reference with identical semantics (for verification)."""
    B, C_in, L_in = x_ncl.shape
    _, C_out, K = weight.shape
    L_out = L_in + K - 1
    out = jnp.zeros((B, C_out, L_out), jnp.float32)
    for k in range(K):
        out = out.at[:, :, k:k + L_in].add(
            jnp.einsum("co,bcl->bol", weight[:, :, k], x_ncl))
    out = out + bias[None, :, None]
    return out.astype(x_ncl.dtype)


if __name__ == "__main__":
    key = jax.random.PRNGKey(0)

    configs = [
        # (B, C_in, C_out, K, L_in)  -- NormConvTranspose1d(C_in, C_out, K), norm='none'
        (2, 4, 6, 5, 16),   # grid=(2,), bt=1
        (4, 4, 6, 3, 24),   # grid=(4,), bt=1 (>=2 steps per core on dual-TC chips)
    ]

    for idx, (B, C_in, C_out, K, L_in) in enumerate(configs):
        key, kx, kw, kb = jax.random.split(key, 4)
        x = jax.random.normal(kx, (B, C_in, L_in), dtype=jnp.float32)
        fan = C_in * K
        weight = jax.random.uniform(kw, (C_in, C_out, K), dtype=jnp.float32,
                                    minval=-1.0, maxval=1.0) / jnp.sqrt(fan)
        bias = jax.random.uniform(kb, (C_out,), dtype=jnp.float32,
                                  minval=-1.0, maxval=1.0) / jnp.sqrt(fan)

        y = norm_conv_transpose1d(x, weight, bias)
        y = jax.block_until_ready(y)

        y_ref = _reference_conv_transpose1d(x, weight, bias)
        assert y.shape == (B, C_out, L_in + K - 1), (idx, y.shape)
        assert jnp.allclose(y, y_ref, atol=1e-5, rtol=1e-5), f"mismatch in config {idx}"

    print("KERNEL_OK")
</pallas_src>

<mosaic_0001>
module attributes {stable_mosaic.version = 11 : i64} {
  func.func @_convtr1d_kernel(%arg0: i32, %arg1: memref<1x4x16xf32, #tpu.memory_space<vmem>>, %arg2: memref<5x6x4xf32, #tpu.memory_space<vmem>>, %arg3: memref<6x1xf32, #tpu.memory_space<vmem>>, %arg4: memref<6x128xf32, #tpu.memory_space<vmem>>, %arg5: memref<4x256xf32, #tpu.memory_space<vmem>>) attributes {dimension_semantics = [#tpu.dimension_semantics<parallel>], iteration_bounds = array<i64: 2>, scalar_prefetch = 0 : i64, scratch_operands = 1 : i64, tpu.core_type = #tpu.core_type<tc>, window_params = [{transform_indices = @transform_0, window_bounds = array<i64: 1, 4, 16>}, {pipeline_mode = #tpu.pipeline_mode<synchronous>, transform_indices = @transform_1, window_bounds = array<i64: 5, 6, 4>}, {pipeline_mode = #tpu.pipeline_mode<synchronous>, transform_indices = @transform_2, window_bounds = array<i64: 6, 1>}, {transform_indices = @transform_3, window_bounds = array<i64: 6, 128>}]} {
    %cst = arith.constant 0.000000e+00 : f32
    %0 = vector.broadcast %cst : f32 to vector<4x4xf32>
    %c0 = arith.constant 0 : index
    %c124 = arith.constant 124 : index
    %1 = vector.load %arg5[%c0, %c124] : memref<4x256xf32, #tpu.memory_space<vmem>>, vector<4x4xf32>
    tpu.vector_store %arg5[%c0, %c124], %0 {strides = array<i32>} : memref<4x256xf32, #tpu.memory_space<vmem>>, vector<4x4xf32>,
    %c0_0 = arith.constant 0 : index
    %c144 = arith.constant 144 : index
    %2 = vector.load %arg5[%c0_0, %c144] : memref<4x256xf32, #tpu.memory_space<vmem>>, vector<4x4xf32>
    tpu.vector_store %arg5[%c0_0, %c144], %0 {strides = array<i32>} : memref<4x256xf32, #tpu.memory_space<vmem>>, vector<4x4xf32>,
    %c0_1 = arith.constant 0 : index
    %c0_2 = arith.constant 0 : index
    %c0_3 = arith.constant 0 : index
    %3 = vector.load %arg1[%c0_1, %c0_2, %c0_3] : memref<1x4x16xf32, #tpu.memory_space<vmem>>, vector<1x4x16xf32>
    %4 = vector.shape_cast %3 : vector<1x4x16xf32> to vector<4x16xf32>
    %c0_4 = arith.constant 0 : index
    %c128 = arith.constant 128 : index
    %5 = vector.load %arg5[%c0_4, %c128] : memref<4x256xf32, #tpu.memory_space<vmem>>, vector<4x16xf32>
    tpu.vector_store %arg5[%c0_4, %c128], %4 {strides = array<i32>} : memref<4x256xf32, #tpu.memory_space<vmem>>, vector<4x16xf32>,
    %c0_5 = arith.constant 0 : index
    %c0_6 = arith.constant 0 : index
    %6 = vector.load %arg3[%c0_5, %c0_6] : memref<6x1xf32, #tpu.memory_space<vmem>>, vector<6x1xf32>
    %7 = vector.shape_cast %6 : vector<6x1xf32> to vector<6x1xf32>
    %8 = vector.broadcast %7 : vector<6x1xf32> to vector<6x128xf32>
    %c0_7 = arith.constant 0 : index
    %c128_8 = arith.constant 128 : index
    %9 = vector.load %arg5[%c0_7, %c128_8] : memref<4x256xf32, #tpu.memory_space<vmem>>, vector<4x128xf32>
    %c0_9 = arith.constant 0 : index
    %c0_10 = arith.constant 0 : index
    %c0_11 = arith.constant 0 : index
    %10 = vector.load %arg2[%c0_9, %c0_10, %c0_11] : memref<5x6x4xf32, #tpu.memory_space<vmem>>, vector<1x6x4xf32>
    %11 = vector.shape_cast %10 : vector<1x6x4xf32> to vector<6x4xf32>
    %cst_12 = arith.constant dense<0.000000e+00> : vector<6x128xf32>
    %12 = tpu.matmul %11, %9, %cst_12 {dimension_numbers = #tpu.dot_dimension_numbers<[1], [0], [0], [1], [0, 0, 1, 1], [], []>} : vector<6x4xf32>, vector<4x128xf32>, vector<6x128xf32> -> vector<6x128xf32>
    %13 = arith.addf %8, %12 : vector<6x128xf32>
    %c0_13 = arith.constant 0 : index
    %c127 = arith.constant 127 : index
    %14 = vector.load %arg5[%c0_13, %c127] : memref<4x256xf32, #tpu.memory_space<vmem>>, vector<4x128xf32>
    %c1 = arith.constant 1 : index
    %c0_14 = arith.constant 0 : index
    %c0_15 = arith.constant 0 : index
    %15 = vector.load %arg2[%c1, %c0_14, %c0_15] : memref<5x6x4xf32, #tpu.memory_space<vmem>>, vector<1x6x4xf32>
    %16 = vector.shape_cast %15 : vector<1x6x4xf32> to vector<6x4xf32>
    %cst_16 = arith.constant dense<0.000000e+00> : vector<6x128xf32>
    %17 = tpu.matmul %16, %14, %cst_16 {dimension_numbers = #tpu.dot_dimension_numbers<[1], [0], [0], [1], [0, 0, 1, 1], [], []>} : vector<6x4xf32>, vector<4x128xf32>, vector<6x128xf32> -> vector<6x128xf32>
    %18 = arith.addf %13, %17 : vector<6x128xf32>
    %c0_17 = arith.constant 0 : index
    %c126 = arith.constant 126 : index
    %19 = vector.load %arg5[%c0_17, %c126] : memref<4x256xf32, #tpu.memory_space<vmem>>, vector<4x128xf32>
    %c2 = arith.constant 2 : index
    %c0_18 = arith.constant 0 : index
    %c0_19 = arith.constant 0 : index
    %20 = vector.load %arg2[%c2, %c0_18, %c0_19] : memref<5x6x4xf32, #tpu.memory_space<vmem>>, vector<1x6x4xf32>
    %21 = vector.shape_cast %20 : vector<1x6x4xf32> to vector<6x4xf32>
    %cst_20 = arith.constant dense<0.000000e+00> : vector<6x128xf32>
    %22 = tpu.matmul %21, %19, %cst_20 {dimension_numbers = #tpu.dot_dimension_numbers<[1], [0], [0], [1], [0, 0, 1, 1], [], []>} : vector<6x4xf32>, vector<4x128xf32>, vector<6x128xf32> -> vector<6x128xf32>
    %23 = arith.addf %18, %22 : vector<6x128xf32>
    %c0_21 = arith.constant 0 : index
    %c125 = arith.constant 125 : index
    %24 = vector.load %arg5[%c0_21, %c125] : memref<4x256xf32, #tpu.memory_space<vmem>>, vector<4x128xf32>
    %c3 = arith.constant 3 : index
    %c0_22 = arith.constant 0 : index
    %c0_23 = arith.constant 0 : index
    %25 = vector.load %arg2[%c3, %c0_22, %c0_23] : memref<5x6x4xf32, #tpu.memory_space<vmem>>, vector<1x6x4xf32>
    %26 = vector.shape_cast %25 : vector<1x6x4xf32> to vector<6x4xf32>
    %cst_24 = arith.constant dense<0.000000e+00> : vector<6x128xf32>
    %27 = tpu.matmul %26, %24, %cst_24 {dimension_numbers = #tpu.dot_dimension_numbers<[1], [0], [0], [1], [0, 0, 1, 1], [], []>} : vector<6x4xf32>, vector<4x128xf32>, vector<6x128xf32> -> vector<6x128xf32>
    %28 = arith.addf %23, %27 : vector<6x128xf32>
    %c0_25 = arith.constant 0 : index
    %c124_26 = arith.constant 124 : index
    %29 = vector.load %arg5[%c0_25, %c124_26] : memref<4x256xf32, #tpu.memory_space<vmem>>, vector<4x128xf32>
    %c4 = arith.constant 4 : index
    %c0_27 = arith.constant 0 : index
    %c0_28 = arith.constant 0 : index
    %30 = vector.load %arg2[%c4, %c0_27, %c0_28] : memref<5x6x4xf32, #tpu.memory_space<vmem>>, vector<1x6x4xf32>
    %31 = vector.shape_cast %30 : vector<1x6x4xf32> to vector<6x4xf32>
    %cst_29 = arith.constant dense<0.000000e+00> : vector<6x128xf32>
    %32 = tpu.matmul %31, %29, %cst_29 {dimension_numbers = #tpu.dot_dimension_numbers<[1], [0], [0], [1], [0, 0, 1, 1], [], []>} : vector<6x4xf32>, vector<4x128xf32>, vector<6x128xf32> -> vector<6x128xf32>
    %33 = arith.addf %28, %32 : vector<6x128xf32>
    %c0_30 = arith.constant 0 : index
    %c0_31 = arith.constant 0 : index
    %34 = vector.load %arg4[%c0_30, %c0_31] : memref<6x128xf32, #tpu.memory_space<vmem>>, vector<6x128xf32>
    tpu.vector_store %arg4[%c0_30, %c0_31], %33 {strides = array<i32>} : memref<6x128xf32, #tpu.memory_space<vmem>>, vector<6x128xf32>,
    return
  }
  func.func @transform_0(%arg0: i32) -> (i32, i32, i32) {
    %c0_i32 = arith.constant 0 : i32
    %c0_i32_0 = arith.constant 0 : i32
    %c0_i32_1 = arith.constant 0 : i32
    return %arg0, %c0_i32, %c0_i32_0 : i32, i32, i32
  }
  func.func @transform_1(%arg0: i32) -> (i32, i32, i32) {
    %c0_i32 = arith.constant 0 : i32
    %c0_i32_0 = arith.constant 0 : i32
    %c0_i32_1 = arith.constant 0 : i32
    %c0_i32_2 = arith.constant 0 : i32
    return %c0_i32, %c0_i32_0, %c0_i32_1 : i32, i32, i32
  }
  func.func @transform_2(%arg0: i32) -> (i32, i32) {
    %c0_i32 = arith.constant 0 : i32
    %c0_i32_0 = arith.constant 0 : i32
    %c0_i32_1 = arith.constant 0 : i32
    return %c0_i32, %c0_i32_0 : i32, i32
  }
  func.func @transform_3(%arg0: i32) -> (i32, i32) {
    %c0_i32 = arith.constant 0 : i32
    %c0_i32_0 = arith.constant 0 : i32
    return %c0_i32, %arg0 : i32, i32
  }
}

</mosaic_0001>

<bundles_post_ra>
// kernel: tpu_custom_call.1
= control target key start
LH: loop header
LB: loop body
LE: loop exit
PB: predicated region body
PF: predicated region fallthrough
CT: control target
= control target key end

     0   :  { %8 = vsyncpa [#allocation4], 0  ;;  %s1005_s0 = inlined_call_operand.vmem [shape: f32[2,4,16], index: 0, kind: input, shape index: {}]   ;;  %s1006_s1 = inlined_call_operand.vmem [shape: f32[5,6,4], index: 1, kind: input, shape index: {}]   ;;  %s1007_s2 = inlined_call_operand.vmem [shape: f32[6,1], index: 2, kind: input, shape index: {}]   ;;  %s1008_s3 = inlined_call_operand.hbm [shape: f32[6,256], index: 3, kind: output, shape index: {}]  }
   0x1   :  { %10 = vsyncpa [#allocation4 + $0x1], 0  ;;  %s878_s12 = smov 0   ;;  %s880_s13 = smov 0  }
   0x2   :  { %s882_s14 = smov 0   ;;  %s884_s15 = smov 0  }
   0x3 LB: > { %s899_s16 = sadd.s32 4294967295, %s848_s15   ;;  %s681_s17 = sadd.s32 4294967294, %s848_s15   ;;  %s848_s15 = sphi %s884_s15, %s1014_s15   ;;  %s844_s14 = sphi %s882_s14, %s1013_s14   ;;  %s840_s13 = sphi %s880_s13, %s1012_s13   ;;  %s836_s12 = sphi %s878_s12, %s1011_s12  }
   0x4   : > { %s903_s18 = sadd.s32 1, %s848_s15   ;;  %s91_s19 = sadd.s32 1, %s844_s14 }
   0x5   : > { %s88_s20 = ssub.s32 %s848_s15, %s903_s18  ;;  %p101_p0 = scmp.ne.s32.totalorder %s844_s14, %s840_s13 }
   0x6   : > { %p89_p1 = scmp.eq.s32.totalorder %s88_s20, 0  ;;  %p102_p2 = scmp.eq.s32.totalorder %s899_s16, 1 }
   0x7   : > { %p107_p3 = scmp.ne.s32.totalorder %s840_s13, %s836_s12  ;;  %p108_p4 = scmp.eq.s32.totalorder %s681_s17, 1 }
   0x8   : > { %s914_s21 = scalar_select %p89_p1, %s844_s14, %s91_s19  }
   0x9   : > { %p916_p5 = por %p102_p2, %p101_p0  ;;  %p920_p6 = por %p108_p4, %p107_p3 }
   0xa   : > { %p684_p7 = scmp.ge.s32.totalorder %s848_s15, 1  ;;  %p139_p8 = scmp.lt.s32.totalorder %s848_s15, 3 }
   0xc   : > { %p140_p9 = pnand %p684_p7, %p139_p8 }
   0xd   : > { %p162_p10 = scmp.lt.s32.totalorder (!%p140_p9), %s899_s16, 1  ;;  %s852_s4 = smov (!%p140_p9), 2  }
   0xe   : > { %143 = sbr.rel (%p140_p9) target bundleno = 369 (0x171), region = 32  ;;  %s853_s5 = smov (!%p140_p9), 1  }
   0xf   : > { %s855_s6 = smov (!%p140_p9), 3   ;;  %s856_s7 = smov (!%p140_p9), 4  }
  0x10   : > { %s159_s27 = sand.u32 (!%p140_p9), 1, %s840_s13   ;;  %s702_s29 = sshll.u32 (!%p140_p9), %s899_s16, 7 }
  0x11   : > { %s609_s8 = scalar_lea.sflag (!%p140_p9), [#allocation4], %s159_s27  ;;  %s857_s10 = smov (!%p140_p9), [#allocation3]  }
  0x13   : > { %vm166_vm0 = vcmask 1044448   ;;  %vm168_vm1 = vcmask 158848   ;;  %v850_v0 = vmov 0.0   ;;  %s163_s24 = scalar_select %p162_p10, %s899_s16, 1  ;;  %vm171_vm2 = vcmask 125952  }
  0x14   : > { %167 = vst.msk [vmem:[#allocation2] sm:$0xf] %vm166_vm0, %v850_v0  ;;  %715 = vmatprep.subr.mxu0 %v850_v0  ;;  %720 = vmatprep.subr.mxu1 %v850_v0  ;;  %vm851_vm3 = vmmov 0   ;;  %vm185_vm4 = vcmask 1043456   ;;  %v180_v4 = vld [vmem:[%s1006_s1] sm:$0x3f] }
  0x15   : > { %169 = vst.msk [vmem:[#allocation2 + $0x4] sm:$0xf] %vm168_vm1, %v850_v0  ;;  %s686_s25 = sshll.u32 %s163_s24, 2  ;;  %717 = vmatprep.mubr.msk.f32.mxu0 %vm851_vm3, %v850_v0  ;;  %722 = vmatprep.mubr.msk.f32.mxu1 %vm851_vm3, %v850_v0  ;;  %vm181_vm5 = vcmask 31744   ;;  %v854_v6 = vmov 0   ;;  %vm356_vm6 = vcmask 15360  }
  0x16   : > { %s165_s28 = scalar_lea.vmem %s1005_s0, %s686_s25  ;;  %786 = vset.pattern.permute.xlu0 %v854_v6  ;;  %v173_v7 = vld [vmem:[%s1007_s2] sm:$0x3f]  ;;  %vm269_vm7 = vcmask 7168   ;;  %v689_v12 = vld [vmem:[%s1006_s1 + $0x8] sm:$0x3f]  ;;  %vm443_vm8 = vcmask 23552  }
  0x17   : > { %v170_v1 = vld [vmem:[%s165_s28] sm:$0xf]  ;;  %v692_v15 = vld [vmem:[%s1006_s1 + $0x10] sm:$0x3f]  ;;  %v695_v18 = vld [vmem:[%s1006_s1 + $0x18] sm:$0x3f] }
  0x18   : > { %172 = vst.msk [vmem:[#allocation2 + $0x4] sm:$0xf] %vm171_vm2, %v170_v1  ;;  %v698_v22 = vld [vmem:[%s1006_s1 + $0x20] sm:$0x3f]  ;;  %s685_s28 = sshll.u32 %s159_s27, 3  ;;  %s792_s16 = sshll.u32 %s857_s10, 4  ;;  %s793_s16 = int_to_ptr.vmem [resolvable:$false] %s792_s16 }
  0x19   : > { %s161_s30 = scalar_lea.vmem [#allocation3], %s685_s28  ;;  %s794_s11 = scalar_lea.vmem %s793_s16, 256 }
  0x1f   : > { %v347_v2 = vld [vmem:[#allocation2] sm:$0xff] }
  0x20   : > { %v179_v3 = vld [vmem:[#allocation2 + $0x4] sm:$0xf]  ;;  %352 = vrot.lane.b32.xlu1 %v347_v2, %s852_s4  ;;  %v351_v5 = vcombine.high %v347_v2, %v347_v2  ;;  %265 = vrot.lane.b32.xlu0 %v347_v2, %s853_s5 }
  0x21   : > { %716 = vmatpush3.msk.msra.mxu0 %vm185_vm4, %v179_v3 }
  0x22   : > { %725 = vmatprep.subr.mxu0 %v850_v0  ;;  %718 = vmatmul.mubr.msk.f32.vlgmr.msra.gmra.mxu0 %vm181_vm5, %v180_v4 }
  0x23   : > { %727 = vmatprep.mubr.msk.f32.mxu0 %vm851_vm3, %v850_v0 }
  0x24   : > { %354 = vrot.lane.b32.xlu1 %v351_v5, %s852_s4  ;;  %267 = vrot.lane.b32.xlu0 %v351_v5, %s853_s5  ;;  %s622_s4 = sshll.u32 %s161_s30, 4  ;;  %s623_s4 = int_to_ptr.vmem [resolvable:$true] %s622_s4 }
  0x25   : > { %s788_s9 = scalar_lea.vmem %s623_s4, 128  ;;  %p795_p0 = scmp.lt.s32.totalorder %s623_s4, %s793_s16 }
  0x26   : > { %p789_p11 = scmp.ne.s32.totalorder %s623_s4, %s788_s9  ;;  %p796_p1 = scmp.lt.s32.totalorder %s794_s11, %s788_s9 }
  0x28   : > { %441 = vrot.lane.b32.xlu1 %v351_v5, %s855_s6  ;;  %439 = vrot.lane.b32.xlu0 %v347_v2, %s855_s6  ;;  %p790_p12 = pnand %p789_p11, %p916_p5  ;;  %p797_p2 = por %p796_p1, %p795_p0 }
  0x2a   : > { %p791_p13 = pneg %p790_p12 }
  0x2c   : > { %528 = vrot.lane.b32.xlu1 %v351_v5, %s856_s7  ;;  %526 = vrot.lane.b32.xlu0 %v347_v2, %s856_s7  ;;  %s970_s7 = scalar_lea.hbm %s1008_s3, %s702_s29  ;;  %p798_p3 = pnand %p797_p2, %p791_p13 }
  0x30   : > { %176 = vperm.xlu0 %786, %v173_v7  }
  0x92   : > { %v353_v8 = vpop.permute.xlu1 %352  ;;  %v266_v9 = vpop.permute.xlu0 %265 }
  0x96   : > { %v355_v10 = vpop.permute.xlu1 %354  ;;  %v268_v11 = vpop.permute.xlu0 %267 }
  0x97   : > { %v357_v13 = vsel %vm356_vm6, %v353_v8, %v355_v10  ;;  %v270_v14 = vsel %vm269_vm7, %v266_v9, %v268_v11 }
  0x98   : > { %721 = vmatpush3.msk.msra.mxu1 %vm185_vm4, %v270_v14  ;;  %726 = vmatpush3.msk.msra.mxu0 %vm185_vm4, %v357_v13 }
  0x99   : > { %730 = vmatprep.subr.mxu1 %v850_v0  ;;  %723 = vmatmul.mubr.msk.f32.vlgmr.msra.gmra.mxu1 %vm181_vm5, %v689_v12 }
  0x9a   : > { %v442_v16 = vpop.permute.xlu1 %441  ;;  %v440_v17 = vpop.permute.xlu0 %439  ;;  %728 = vmatmul.mubr.msk.f32.vlgmr.msra.gmra.mxu0 %vm181_vm5, %v692_v15  ;;  %732 = vmatprep.mubr.msk.f32.mxu1 %vm851_vm3, %v850_v0 }
  0x9b   : > { %v444_v19 = vsel %vm443_vm8, %v440_v17, %v442_v16  ;;  %735 = vmatprep.subr.mxu0 %v850_v0  ;;  %737 = vmatprep.mubr.msk.f32.mxu0 %vm851_vm3, %v850_v0 }
  0x9c   : > { %731 = vmatpush3.msk.msra.mxu1 %vm185_vm4, %v444_v19 }
  0x9d   : > { %733 = vmatmul.mubr.msk.f32.vlgmr.msra.gmra.mxu1 %vm181_vm5, %v695_v18 }
  0x9e   : > { %v529_v20 = vpop.permute.xlu1 %528  ;;  %v527_v21 = vpop.permute.xlu0 %526 }
  0x9f   : > { %v530_v23 = vsel %vm181_vm5, %v527_v21, %v529_v20 }
  0xa0   : > { %736 = vmatpush3.msk.msra.mxu0 %vm185_vm4, %v530_v23 }
  0xa1   : > { %738 = vmatmul.mubr.msk.f32.vlgmr.msra.gmra.mxu0 %vm181_vm5, %v698_v22 }
  0xab   : > { %v177_v26 = vpop.permute.xlu0 %176 }
  0xe2   : > { %v255_v24 = vpop.f32.mrf.mxu0 }
  0xe3   : > { %v259_v27 = vadd.f32 %v255_v24, %v177_v26 }
  0xe4   : > { %v719_v25 = vpop.f32.mrf.mxu0 }
 0x159   : > { %v342_v28 = vpop.f32.mrf.mxu1 }
 0x15a   : > { %v346_v29 = vadd.f32 %v342_v28, %v259_v27  ;;  %v429_v30 = vpop.f32.mrf.mxu0 }
 0x15b   : > { %v724_v31 = vpop.f32.mrf.mxu1 }
 0x15c   : > { %v433_v32 = vadd.f32 %v429_v30, %v346_v29  ;;  %v729_v33 = vpop.f32.mrf.mxu0 }
 0x15d   : > { %v516_v34 = vpop.f32.mrf.mxu1 }
 0x15e   : > { %v520_v35 = vadd.f32 %v516_v34, %v433_v32 }
 0x15f   : > { %v734_v36 = vpop.f32.mrf.mxu1 }
 0x161   : > { %v602_v37 = vpop.f32.mrf.mxu0 }
 0x162   : > { %v606_v38 = vadd.f32 %v602_v37, %v520_v35 }
 0x163   : > { %v739_v39 = vpop.f32.mrf.mxu0 }
 0x164   : > { %607 = vst [vmem:[%s161_s30] sm:$0x3f] %v606_v38 }
 0x165   : > { %801 = shalt.err (!%p798_p3)
}
 0x166   : > { %s802_s17 = scalar_lea.hbm %s970_s7, 128  ;;  %s806_s24 = scalar_lea.hbm %s1008_s3, 256 }
 0x167   : > { %p803_p4 = scmp.ne.s32.totalorder %s970_s7, %s802_s17  ;;  %p807_p9 = scmp.lt.s32.totalorder %s970_s7, %s1008_s3 }
 0x168   : > { %p808_p10 = scmp.lt.s32.totalorder %s806_s24, %s802_s17 }
 0x169   : > { %p804_p7 = pnand %p803_p4, %p916_p5 }
 0x16a   : > { %p809_p11 = por %p808_p10, %p807_p9 }
 0x16b   : > { %p805_p8 = pneg %p804_p7 }
 0x16d   : > { %p810_p12 = pnand %p809_p11, %p805_p8 }
 0x16f   : > { %813 = shalt.err (!%p810_p12)
}
 0x170   : > { %740 = dma.vmem_to_hbm [thread:$0]  (%p916_p5), %s623_s4, 128, %s970_s7, %s609_s8  }
 0x171 PF: > { %p746_p13 = scmp.ge.s32.totalorder %s848_s15, 2  ;;  %s634_s27 = sand.u32 1, %s836_s12  }
 0x172   : > { %s635_s28 = scalar_lea.sflag [#allocation4], %s634_s27 }
 0x173   : > { %p743_p0 = pnand %p746_p13, %p920_p6 }
 0x175   : > { %p744_p1 = pneg %p743_p0 }
 0x177   : > { %831 = dma.done.wait (%p744_p1), %s635_s28, 128  }
 0x178   : > { %833 = vsyncadd (%p744_p1), %s635_s28, 4294967168  ;;  %p13_p2 = scmp.ge.s32.totalorder %s903_s18, 4   ;;  %s1011_s12 = smov %s840_s13 }
 0x179   : > { %s1012_s13 = smov %s844_s14  ;;  %s1013_s14 = smov %s914_s21 }
 0x17a   : > { %s1014_s15 = smov %s903_s18  ;;  %15 = sbr.rel (!%p13_p2) target bundleno = 3 (0x3), region = 71 }
 0x17f   :  { %640 = vsyncpa [#allocation4], 1 }
 0x180   :  { %642 = vsyncpa [#allocation4 + $0x1], 1 }

</bundles_post_ra>
